<compile_context>
chip_gen: v7x
topology: tpu7x:2x2x1
jax: 0.10.0
libtpu: 0.0.40
codegen_flags: <defaults>
</compile_context>

<pallas_src>
import functools

import jax
import jax.numpy as jnp
from jax.experimental import pallas as pl
from jax.experimental.pallas import tpu as pltpu


_PARAM_NAMES = ("w_sage_t", "b_sage_t", "w_sage_s", "b_sage_s",
                "w_qkv", "b_qkv", "w_o", "b_o")


def _round_up(n, m):
    return ((n + m - 1) // m) * m


def attention_le_conv_kernel(xa_ref,
                             wst_ref, bst_ref, wss_ref, bss_ref,
                             wqkv_ref, bqkv_ref, wo_ref, bo_ref,
                             out_ref, *, num_branches, apply_relu):
    """Dense part of AttentionLEConv for `num_branches` stacked weight sets.

    xa_ref : (TN, 2*Cin) bf16   -- [mean_aggr | x] node rows
    w*_ref : stacked per-branch weights (leading dim = num_branches)
    out_ref: (K, TN, Cout) f32
    """
    xa = xa_ref[...]                          # load once, shared across branches
    c = wo_ref.shape[-1]                      # out channels (static)
    scale = 1.0 / float(c) ** 0.5             # single-head MHA: head_dim == embed_dim

    for b in range(num_branches):
        # SAGEConv (mean aggr), topology & sequence branches:
        #   lin_l(agg) + lin_r(x)  ==  [agg|x] @ [W_l ; W_r]  (single fused matmul)
        h_t = jnp.dot(xa, wst_ref[b], preferred_element_type=jnp.float32) + bst_ref[b]
        h_s = jnp.dot(xa, wss_ref[b], preferred_element_type=jnp.float32) + bss_ref[b]
        h_t16 = h_t.astype(jnp.bfloat16)
        h_s16 = h_s.astype(jnp.bfloat16)

        # Fused Q/K/V projection (one (C, 3C) weight) per token.
        qkv_t = (jnp.dot(h_t16, wqkv_ref[b], preferred_element_type=jnp.float32)
                 + bqkv_ref[b])
        qkv_s = (jnp.dot(h_s16, wqkv_ref[b], preferred_element_type=jnp.float32)
                 + bqkv_ref[b])
        q_t, k_t, v_t = qkv_t[:, :c], qkv_t[:, c:2 * c], qkv_t[:, 2 * c:]
        q_s, k_s, v_s = qkv_s[:, :c], qkv_s[:, c:2 * c], qkv_s[:, 2 * c:]

        # Softmax over the 2-token sequence collapses to a sigmoid of the score
        # gap; the key difference dk is shared by both query tokens.
        dk = k_t - k_s
        d_t = jnp.sum(q_t * dk, axis=-1, keepdims=True) * scale
        d_s = jnp.sum(q_s * dk, axis=-1, keepdims=True) * scale
        # sigmoid(x) = 0.5*(tanh(x/2)+1); tanh runs on the EUP slot.
        # w_att = 0.5*(sigmoid(d_t) + sigmoid(d_s)) = mean weight on v_t.
        w_att = 0.25 * (jnp.tanh(0.5 * d_t) + jnp.tanh(0.5 * d_s)) + 0.5
        o = w_att * v_t + (1.0 - w_att) * v_s   # == 0.5*(o_topo + o_seq)

        # 0.5*(W_o o_t + b_o + W_o o_s + b_o) == W_o (0.5*(o_t+o_s)) + b_o.
        out = (jnp.dot(o.astype(jnp.bfloat16), wo_ref[b],
                       preferred_element_type=jnp.float32) + bo_ref[b])
        if apply_relu:
            out = jnp.maximum(out, 0.0)
        out_ref[b] = out.astype(out_ref.dtype)


def attention_le_conv(x, agg, params, *, apply_relu, tile_n=512):
    """Run K stacked AttentionLEConv branches over shared (x, agg) node tiles."""
    n = x.shape[0]
    k = params["w_sage_t"].shape[0]
    c_out = params["w_sage_t"].shape[2]

    # One input stream: [mean_aggr | x], matching [W_l ; W_r] weight stacking.
    xa = jnp.concatenate([agg, x], axis=1).astype(jnp.bfloat16)   # (N, 2*Cin)
    c2 = xa.shape[1]

    tn = min(tile_n, _round_up(n, 8))          # large tiles, multiple of 8
    n_pad = _round_up(n, tn)
    if n_pad != n:                              # skip pad pass when already aligned
        xa = jnp.pad(xa, ((0, n_pad - n), (0, 0)))

    weights = [params[name] for name in _PARAM_NAMES]

    row_spec = pl.BlockSpec((tn, c2), lambda i: (i, 0))
    const3 = lambda i: (0, 0, 0)                # VMEM-resident weights / biases
    in_specs = [row_spec] + [pl.BlockSpec(w.shape, const3) for w in weights]

    out = pl.pallas_call(
        functools.partial(attention_le_conv_kernel,
                          num_branches=k, apply_relu=apply_relu),
        out_shape=jax.ShapeDtypeStruct((k, n_pad, c_out), jnp.float32),
        grid=(n_pad // tn,),
        in_specs=in_specs,
        out_specs=pl.BlockSpec((k, tn, c_out), lambda i: (0, i, 0)),
        compiler_params=pltpu.CompilerParams(
            dimension_semantics=("parallel",),
            vmem_limit_bytes=32 * 1024 * 1024),
    )(xa, *weights)

    return out[:, :n, :]


def sage_mean_aggregate(x, edge_index, num_nodes):
    # TODO(synk): data-dependent scatter-mean stays in XLA glue; a rectangular
    # BlockSpec cannot express it and an in-kernel DMA gather is not worth it here.
    src, dst = edge_index[0], edge_index[1]
    msg = jnp.zeros((num_nodes, x.shape[1]), jnp.float32).at[dst].add(
        x[src].astype(jnp.float32))
    deg = jnp.zeros((num_nodes,), jnp.float32).at[dst].add(1.0)
    return msg / jnp.maximum(deg, 1.0)[:, None]


def variational_attention_le_encoder_forward(x, edge_index, params, *, tile_n=512):
    """VariationalAttentionLeEncoder.forward(x, edge_index) -> (mu, logstd)."""
    n = x.shape[0]
    # conv1 + ReLU
    agg1 = sage_mean_aggregate(x, edge_index, n)
    h = attention_le_conv(x, agg1, params["conv1"], apply_relu=True,
                          tile_n=tile_n)[0]
    # conv_mu and conv_logstd fused into a single pallas_call (shared h/agg reads).
    agg2 = sage_mean_aggregate(h, edge_index, n)
    mu_ls = attention_le_conv(h, agg2, params["mu_logstd"], apply_relu=False,
                              tile_n=tile_n)
    return mu_ls[0], mu_ls[1]


# ----------------------------- parameter init -------------------------------

def _init_linear(key, fan_in, fan_out, bias=True):
    """PyTorch-style Linear init: U(-1/sqrt(fan_in), 1/sqrt(fan_in)), [in,out] layout."""
    kw, kb = jax.random.split(key)
    bound = 1.0 / float(fan_in) ** 0.5
    w = jax.random.uniform(kw, (fan_in, fan_out), jnp.float32, -bound, bound)
    if bias:
        b = jax.random.uniform(kb, (fan_out,), jnp.float32, -bound, bound)
    else:
        b = jnp.zeros((fan_out,), jnp.float32)
    return w, b


def init_attention_le_conv(key, in_c, out_c):
    ks = jax.random.split(key, 8)
    wl_t, bl_t = _init_linear(ks[0], in_c, out_c)            # topology SAGE lin_l
    wr_t, _ = _init_linear(ks[1], in_c, out_c, bias=False)   # topology SAGE lin_r
    wl_s, bl_s = _init_linear(ks[2], in_c, out_c)            # sequence SAGE lin_l
    wr_s, _ = _init_linear(ks[3], in_c, out_c, bias=False)   # sequence SAGE lin_r
    wq, bq = _init_linear(ks[4], out_c, out_c)                # MHA projections
    wk, bk = _init_linear(ks[5], out_c, out_c)
    wv, bv = _init_linear(ks[6], out_c, out_c)
    wo, bo = _init_linear(ks[7], out_c, out_c)
    return {"wl_t": wl_t, "bl_t": bl_t, "wr_t": wr_t,
            "wl_s": wl_s, "bl_s": bl_s, "wr_s": wr_s,
            "wq": wq, "bq": bq, "wk": wk, "bk": bk,
            "wv": wv, "bv": bv, "wo": wo, "bo": bo}


def _stack_branches(branches):
    """Stack K per-branch dicts into the fused kernel layout.

    Weights -> bf16, biases -> f32 (K, 1, C). SAGE lin_l/lin_r concatenated along
    the input dim (matches [agg|x]); Q/K/V concatenated along the output dim.
    """
    def stack(fn, dtype):
        return jnp.stack([fn(br) for br in branches]).astype(dtype)

    return {
        "w_sage_t": stack(lambda br: jnp.concatenate([br["wl_t"], br["wr_t"]], 0),
                          jnp.bfloat16),
        "b_sage_t": stack(lambda br: br["bl_t"].reshape(1, -1), jnp.float32),
        "w_sage_s": stack(lambda br: jnp.concatenate([br["wl_s"], br["wr_s"]], 0),
                          jnp.bfloat16),
        "b_sage_s": stack(lambda br: br["bl_s"].reshape(1, -1), jnp.float32),
        "w_qkv": stack(lambda br: jnp.concatenate([br["wq"], br["wk"], br["wv"]], 1),
                       jnp.bfloat16),
        "b_qkv": stack(lambda br: jnp.concatenate(
            [br["bq"], br["bk"], br["bv"]]).reshape(1, -1), jnp.float32),
        "w_o": stack(lambda br: br["wo"], jnp.bfloat16),
        "b_o": stack(lambda br: br["bo"].reshape(1, -1), jnp.float32),
    }


def init_encoder_params(key, in_channels, out_channels):
    k1, k2, k3 = jax.random.split(key, 3)
    conv1 = init_attention_le_conv(k1, in_channels, 2 * out_channels)
    conv_mu = init_attention_le_conv(k2, 2 * out_channels, out_channels)
    conv_ls = init_attention_le_conv(k3, 2 * out_channels, out_channels)
    return {"conv1": _stack_branches([conv1]),
            "mu_logstd": _stack_branches([conv_mu, conv_ls])}


if __name__ == "__main__":
    key = jax.random.PRNGKey(0)
    kx, ke, kp = jax.random.split(key, 3)

    num_nodes, num_edges = 16, 40
    in_channels, out_channels = 16, 8

    x = jax.random.normal(kx, (num_nodes, in_channels), jnp.float32)
    edge_index = jax.random.randint(ke, (2, num_edges), 0, num_nodes, jnp.int32)
    params = init_encoder_params(kp, in_channels, out_channels)

    fwd = jax.jit(functools.partial(variational_attention_le_encoder_forward,
                                    tile_n=512))
    mu, logstd = fwd(x, edge_index, params)
    mu, logstd = jax.block_until_ready((mu, logstd))

    assert mu.shape == (num_nodes, out_channels)
    assert logstd.shape == (num_nodes, out_channels)
    assert bool(jnp.all(jnp.isfinite(mu)))
    assert bool(jnp.all(jnp.isfinite(logstd)))
    print("KERNEL_OK")
</pallas_src>

<mosaic_0001>
module attributes {stable_mosaic.version = 11 : i64} {
  func.func @attention_le_conv_kernel(%arg0: i32, %arg1: memref<16x32xbf16, #tpu.memory_space<vmem>>, %arg2: memref<1x32x16xbf16, #tpu.memory_space<vmem>>, %arg3: memref<1x1x16xf32, #tpu.memory_space<vmem>>, %arg4: memref<1x32x16xbf16, #tpu.memory_space<vmem>>, %arg5: memref<1x1x16xf32, #tpu.memory_space<vmem>>, %arg6: memref<1x16x48xbf16, #tpu.memory_space<vmem>>, %arg7: memref<1x1x48xf32, #tpu.memory_space<vmem>>, %arg8: memref<1x16x16xbf16, #tpu.memory_space<vmem>>, %arg9: memref<1x1x16xf32, #tpu.memory_space<vmem>>, %arg10: memref<1x16x16xf32, #tpu.memory_space<vmem>>) attributes {dimension_semantics = [#tpu.dimension_semantics<parallel>], iteration_bounds = array<i64: 1>, scalar_prefetch = 0 : i64, scratch_operands = 0 : i64, tpu.core_type = #tpu.core_type<tc>, window_params = [{transform_indices = @transform_0, window_bounds = array<i64: 16, 32>}, {pipeline_mode = #tpu.pipeline_mode<synchronous>, transform_indices = @transform_1, window_bounds = array<i64: 1, 32, 16>}, {pipeline_mode = #tpu.pipeline_mode<synchronous>, transform_indices = @transform_2, window_bounds = array<i64: 1, 1, 16>}, {pipeline_mode = #tpu.pipeline_mode<synchronous>, transform_indices = @transform_3, window_bounds = array<i64: 1, 32, 16>}, {pipeline_mode = #tpu.pipeline_mode<synchronous>, transform_indices = @transform_4, window_bounds = array<i64: 1, 1, 16>}, {pipeline_mode = #tpu.pipeline_mode<synchronous>, transform_indices = @transform_5, window_bounds = array<i64: 1, 16, 48>}, {pipeline_mode = #tpu.pipeline_mode<synchronous>, transform_indices = @transform_6, window_bounds = array<i64: 1, 1, 48>}, {pipeline_mode = #tpu.pipeline_mode<synchronous>, transform_indices = @transform_7, window_bounds = array<i64: 1, 16, 16>}, {pipeline_mode = #tpu.pipeline_mode<synchronous>, transform_indices = @transform_8, window_bounds = array<i64: 1, 1, 16>}, {transform_indices = @transform_9, window_bounds = array<i64: 1, 16, 16>}]} {
    %c0 = arith.constant 0 : index
    %c0_0 = arith.constant 0 : index
    %0 = vector.load %arg1[%c0, %c0_0] : memref<16x32xbf16, #tpu.memory_space<vmem>>, vector<16x32xbf16>
    %c0_1 = arith.constant 0 : index
    %c0_2 = arith.constant 0 : index
    %c0_3 = arith.constant 0 : index
    %1 = vector.load %arg2[%c0_1, %c0_2, %c0_3] : memref<1x32x16xbf16, #tpu.memory_space<vmem>>, vector<1x32x16xbf16>
    %2 = vector.shape_cast %1 : vector<1x32x16xbf16> to vector<32x16xbf16>
    %cst = arith.constant dense<0.000000e+00> : vector<16x16xf32>
    %3 = tpu.matmul %0, %2, %cst {dimension_numbers = #tpu.dot_dimension_numbers<[1], [0], [0], [1], [0, 0, 1, 1], [], []>} : vector<16x32xbf16>, vector<32x16xbf16>, vector<16x16xf32> -> vector<16x16xf32>
    %c0_4 = arith.constant 0 : index
    %c0_5 = arith.constant 0 : index
    %c0_6 = arith.constant 0 : index
    %4 = vector.load %arg3[%c0_4, %c0_5, %c0_6] : memref<1x1x16xf32, #tpu.memory_space<vmem>>, vector<1x1x16xf32>
    %5 = vector.shape_cast %4 : vector<1x1x16xf32> to vector<1x16xf32>
    %6 = vector.broadcast %5 : vector<1x16xf32> to vector<16x16xf32>
    %7 = arith.addf %3, %6 : vector<16x16xf32>
    %c0_7 = arith.constant 0 : index
    %c0_8 = arith.constant 0 : index
    %c0_9 = arith.constant 0 : index
    %8 = vector.load %arg4[%c0_7, %c0_8, %c0_9] : memref<1x32x16xbf16, #tpu.memory_space<vmem>>, vector<1x32x16xbf16>
    %9 = vector.shape_cast %8 : vector<1x32x16xbf16> to vector<32x16xbf16>
    %cst_10 = arith.constant dense<0.000000e+00> : vector<16x16xf32>
    %10 = tpu.matmul %0, %9, %cst_10 {dimension_numbers = #tpu.dot_dimension_numbers<[1], [0], [0], [1], [0, 0, 1, 1], [], []>} : vector<16x32xbf16>, vector<32x16xbf16>, vector<16x16xf32> -> vector<16x16xf32>
    %c0_11 = arith.constant 0 : index
    %c0_12 = arith.constant 0 : index
    %c0_13 = arith.constant 0 : index
    %11 = vector.load %arg5[%c0_11, %c0_12, %c0_13] : memref<1x1x16xf32, #tpu.memory_space<vmem>>, vector<1x1x16xf32>
    %12 = vector.shape_cast %11 : vector<1x1x16xf32> to vector<1x16xf32>
    %13 = vector.broadcast %12 : vector<1x16xf32> to vector<16x16xf32>
    %14 = arith.addf %10, %13 : vector<16x16xf32>
    %15 = arith.truncf %7 : vector<16x16xf32> to vector<16x16xbf16>
    %16 = arith.truncf %14 : vector<16x16xf32> to vector<16x16xbf16>
    %c0_14 = arith.constant 0 : index
    %c0_15 = arith.constant 0 : index
    %c0_16 = arith.constant 0 : index
    %17 = vector.load %arg6[%c0_14, %c0_15, %c0_16] : memref<1x16x48xbf16, #tpu.memory_space<vmem>>, vector<1x16x48xbf16>
    %18 = vector.shape_cast %17 : vector<1x16x48xbf16> to vector<16x48xbf16>
    %cst_17 = arith.constant dense<0.000000e+00> : vector<16x48xf32>
    %19 = tpu.matmul %15, %18, %cst_17 {dimension_numbers = #tpu.dot_dimension_numbers<[1], [0], [0], [1], [0, 0, 1, 1], [], []>} : vector<16x16xbf16>, vector<16x48xbf16>, vector<16x48xf32> -> vector<16x48xf32>
    %c0_18 = arith.constant 0 : index
    %c0_19 = arith.constant 0 : index
    %c0_20 = arith.constant 0 : index
    %20 = vector.load %arg7[%c0_18, %c0_19, %c0_20] : memref<1x1x48xf32, #tpu.memory_space<vmem>>, vector<1x1x48xf32>
    %21 = vector.shape_cast %20 : vector<1x1x48xf32> to vector<1x48xf32>
    %22 = vector.broadcast %21 : vector<1x48xf32> to vector<16x48xf32>
    %23 = arith.addf %19, %22 : vector<16x48xf32>
    %c0_21 = arith.constant 0 : index
    %c0_22 = arith.constant 0 : index
    %c0_23 = arith.constant 0 : index
    %24 = vector.load %arg6[%c0_21, %c0_22, %c0_23] : memref<1x16x48xbf16, #tpu.memory_space<vmem>>, vector<1x16x48xbf16>
    %25 = vector.shape_cast %24 : vector<1x16x48xbf16> to vector<16x48xbf16>
    %cst_24 = arith.constant dense<0.000000e+00> : vector<16x48xf32>
    %26 = tpu.matmul %16, %25, %cst_24 {dimension_numbers = #tpu.dot_dimension_numbers<[1], [0], [0], [1], [0, 0, 1, 1], [], []>} : vector<16x16xbf16>, vector<16x48xbf16>, vector<16x48xf32> -> vector<16x48xf32>
    %c0_25 = arith.constant 0 : index
    %c0_26 = arith.constant 0 : index
    %c0_27 = arith.constant 0 : index
    %27 = vector.load %arg7[%c0_25, %c0_26, %c0_27] : memref<1x1x48xf32, #tpu.memory_space<vmem>>, vector<1x1x48xf32>
    %28 = vector.shape_cast %27 : vector<1x1x48xf32> to vector<1x48xf32>
    %29 = vector.broadcast %28 : vector<1x48xf32> to vector<16x48xf32>
    %30 = arith.addf %26, %29 : vector<16x48xf32>
    %31 = vector.extract_strided_slice %23 {offsets = [0, 0], sizes = [16, 16], strides = [1, 1]} : vector<16x48xf32> to vector<16x16xf32>
    %32 = vector.extract_strided_slice %23 {offsets = [0, 16], sizes = [16, 16], strides = [1, 1]} : vector<16x48xf32> to vector<16x16xf32>
    %33 = vector.extract_strided_slice %23 {offsets = [0, 32], sizes = [16, 16], strides = [1, 1]} : vector<16x48xf32> to vector<16x16xf32>
    %34 = vector.extract_strided_slice %30 {offsets = [0, 0], sizes = [16, 16], strides = [1, 1]} : vector<16x48xf32> to vector<16x16xf32>
    %35 = vector.extract_strided_slice %30 {offsets = [0, 16], sizes = [16, 16], strides = [1, 1]} : vector<16x48xf32> to vector<16x16xf32>
    %36 = vector.extract_strided_slice %30 {offsets = [0, 32], sizes = [16, 16], strides = [1, 1]} : vector<16x48xf32> to vector<16x16xf32>
    %37 = arith.subf %32, %35 : vector<16x16xf32>
    %38 = arith.mulf %31, %37 : vector<16x16xf32>
    %cst_28 = arith.constant dense<0.000000e+00> : vector<16xf32>
    %39 = vector.multi_reduction <add>, %38, %cst_28 [1] : vector<16x16xf32> to vector<16xf32>
    %40 = vector.shape_cast %39 : vector<16xf32> to vector<16x1xf32>
    %cst_29 = arith.constant 2.500000e-01 : f32
    %41 = vector.broadcast %cst_29 : f32 to vector<16x1xf32>
    %42 = arith.mulf %40, %41 : vector<16x1xf32>
    %43 = arith.mulf %34, %37 : vector<16x16xf32>
    %cst_30 = arith.constant dense<0.000000e+00> : vector<16xf32>
    %44 = vector.multi_reduction <add>, %43, %cst_30 [1] : vector<16x16xf32> to vector<16xf32>
    %45 = vector.shape_cast %44 : vector<16xf32> to vector<16x1xf32>
    %cst_31 = arith.constant 2.500000e-01 : f32
    %46 = vector.broadcast %cst_31 : f32 to vector<16x1xf32>
    %47 = arith.mulf %45, %46 : vector<16x1xf32>
    %cst_32 = arith.constant 5.000000e-01 : f32
    %48 = vector.broadcast %cst_32 : f32 to vector<16x1xf32>
    %49 = arith.mulf %48, %42 : vector<16x1xf32>
    %50 = math.tanh %49 : vector<16x1xf32>
    %cst_33 = arith.constant 5.000000e-01 : f32
    %51 = vector.broadcast %cst_33 : f32 to vector<16x1xf32>
    %52 = arith.mulf %51, %47 : vector<16x1xf32>
    %53 = math.tanh %52 : vector<16x1xf32>
    %54 = arith.addf %50, %53 : vector<16x1xf32>
    %cst_34 = arith.constant 2.500000e-01 : f32
    %55 = vector.broadcast %cst_34 : f32 to vector<16x1xf32>
    %56 = arith.mulf %55, %54 : vector<16x1xf32>
    %cst_35 = arith.constant 5.000000e-01 : f32
    %57 = vector.broadcast %cst_35 : f32 to vector<16x1xf32>
    %58 = arith.addf %56, %57 : vector<16x1xf32>
    %59 = vector.broadcast %58 : vector<16x1xf32> to vector<16x16xf32>
    %60 = arith.mulf %59, %33 : vector<16x16xf32>
    %cst_36 = arith.constant 1.000000e+00 : f32
    %61 = vector.broadcast %cst_36 : f32 to vector<16x1xf32>
    %62 = arith.subf %61, %58 : vector<16x1xf32>
    %63 = vector.broadcast %62 : vector<16x1xf32> to vector<16x16xf32>
    %64 = arith.mulf %63, %36 : vector<16x16xf32>
    %65 = arith.addf %60, %64 : vector<16x16xf32>
    %66 = arith.truncf %65 : vector<16x16xf32> to vector<16x16xbf16>
    %c0_37 = arith.constant 0 : index
    %c0_38 = arith.constant 0 : index
    %c0_39 = arith.constant 0 : index
    %67 = vector.load %arg8[%c0_37, %c0_38, %c0_39] : memref<1x16x16xbf16, #tpu.memory_space<vmem>>, vector<1x16x16xbf16>
    %68 = vector.shape_cast %67 : vector<1x16x16xbf16> to vector<16x16xbf16>
    %cst_40 = arith.constant dense<0.000000e+00> : vector<16x16xf32>
    %69 = tpu.matmul %66, %68, %cst_40 {dimension_numbers = #tpu.dot_dimension_numbers<[1], [0], [0], [1], [0, 0, 1, 1], [], []>} : vector<16x16xbf16>, vector<16x16xbf16>, vector<16x16xf32> -> vector<16x16xf32>
    %c0_41 = arith.constant 0 : index
    %c0_42 = arith.constant 0 : index
    %c0_43 = arith.constant 0 : index
    %70 = vector.load %arg9[%c0_41, %c0_42, %c0_43] : memref<1x1x16xf32, #tpu.memory_space<vmem>>, vector<1x1x16xf32>
    %71 = vector.shape_cast %70 : vector<1x1x16xf32> to vector<1x16xf32>
    %72 = vector.broadcast %71 : vector<1x16xf32> to vector<16x16xf32>
    %73 = arith.addf %69, %72 : vector<16x16xf32>
    %cst_44 = arith.constant 0.000000e+00 : f32
    %74 = vector.broadcast %cst_44 : f32 to vector<16x16xf32>
    %75 = arith.maximumf %73, %74 : vector<16x16xf32>
    %c0_45 = arith.constant 0 : index
    %c0_46 = arith.constant 0 : index
    %c0_47 = arith.constant 0 : index
    %76 = vector.load %arg10[%c0_45, %c0_46, %c0_47] : memref<1x16x16xf32, #tpu.memory_space<vmem>>, vector<1x16x16xf32>
    %77 = vector.shape_cast %76 : vector<1x16x16xf32> to vector<16x16xf32>
    %78 = vector.shape_cast %75 : vector<16x16xf32> to vector<1x16x16xf32>
    tpu.vector_store %arg10[%c0_45, %c0_46, %c0_47], %78 {strides = array<i32>} : memref<1x16x16xf32, #tpu.memory_space<vmem>>, vector<1x16x16xf32>,
    return
  }
  func.func @transform_0(%arg0: i32) -> (i32, i32) {
    %c0_i32 = arith.constant 0 : i32
    %c0_i32_0 = arith.constant 0 : i32
    return %arg0, %c0_i32 : i32, i32
  }
  func.func @transform_1(%arg0: i32) -> (i32, i32, i32) {
    %c0_i32 = arith.constant 0 : i32
    %c0_i32_0 = arith.constant 0 : i32
    %c0_i32_1 = arith.constant 0 : i32
    %c0_i32_2 = arith.constant 0 : i32
    return %c0_i32, %c0_i32_0, %c0_i32_1 : i32, i32, i32
  }
  func.func @transform_2(%arg0: i32) -> (i32, i32, i32) {
    %c0_i32 = arith.constant 0 : i32
    %c0_i32_0 = arith.constant 0 : i32
    %c0_i32_1 = arith.constant 0 : i32
    %c0_i32_2 = arith.constant 0 : i32
    return %c0_i32, %c0_i32_0, %c0_i32_1 : i32, i32, i32
  }
  func.func @transform_3(%arg0: i32) -> (i32, i32, i32) {
    %c0_i32 = arith.constant 0 : i32
    %c0_i32_0 = arith.constant 0 : i32
    %c0_i32_1 = arith.constant 0 : i32
    %c0_i32_2 = arith.constant 0 : i32
    return %c0_i32, %c0_i32_0, %c0_i32_1 : i32, i32, i32
  }
  func.func @transform_4(%arg0: i32) -> (i32, i32, i32) {
    %c0_i32 = arith.constant 0 : i32
    %c0_i32_0 = arith.constant 0 : i32
    %c0_i32_1 = arith.constant 0 : i32
    %c0_i32_2 = arith.constant 0 : i32
    return %c0_i32, %c0_i32_0, %c0_i32_1 : i32, i32, i32
  }
  func.func @transform_5(%arg0: i32) -> (i32, i32, i32) {
    %c0_i32 = arith.constant 0 : i32
    %c0_i32_0 = arith.constant 0 : i32
    %c0_i32_1 = arith.constant 0 : i32
    %c0_i32_2 = arith.constant 0 : i32
    return %c0_i32, %c0_i32_0, %c0_i32_1 : i32, i32, i32
  }
  func.func @transform_6(%arg0: i32) -> (i32, i32, i32) {
    %c0_i32 = arith.constant 0 : i32
    %c0_i32_0 = arith.constant 0 : i32
    %c0_i32_1 = arith.constant 0 : i32
    %c0_i32_2 = arith.constant 0 : i32
    return %c0_i32, %c0_i32_0, %c0_i32_1 : i32, i32, i32
  }
  func.func @transform_7(%arg0: i32) -> (i32, i32, i32) {
    %c0_i32 = arith.constant 0 : i32
    %c0_i32_0 = arith.constant 0 : i32
    %c0_i32_1 = arith.constant 0 : i32
    %c0_i32_2 = arith.constant 0 : i32
    return %c0_i32, %c0_i32_0, %c0_i32_1 : i32, i32, i32
  }
  func.func @transform_8(%arg0: i32) -> (i32, i32, i32) {
    %c0_i32 = arith.constant 0 : i32
    %c0_i32_0 = arith.constant 0 : i32
    %c0_i32_1 = arith.constant 0 : i32
    %c0_i32_2 = arith.constant 0 : i32
    return %c0_i32, %c0_i32_0, %c0_i32_1 : i32, i32, i32
  }
  func.func @transform_9(%arg0: i32) -> (i32, i32, i32) {
    %c0_i32 = arith.constant 0 : i32
    %c0_i32_0 = arith.constant 0 : i32
    %c0_i32_1 = arith.constant 0 : i32
    return %c0_i32, %arg0, %c0_i32_0 : i32, i32, i32
  }
}

module attributes {stable_mosaic.version = 11 : i64} {
  func.func @attention_le_conv_kernel(%arg0: i32, %arg1: memref<16x32xbf16, #tpu.memory_space<vmem>>, %arg2: memref<2x32x8xbf16, #tpu.memory_space<vmem>>, %arg3: memref<2x1x8xf32, #tpu.memory_space<vmem>>, %arg4: memref<2x32x8xbf16, #tpu.memory_space<vmem>>, %arg5: memref<2x1x8xf32, #tpu.memory_space<vmem>>, %arg6: memref<2x8x24xbf16, #tpu.memory_space<vmem>>, %arg7: memref<2x1x24xf32, #tpu.memory_space<vmem>>, %arg8: memref<2x8x8xbf16, #tpu.memory_space<vmem>>, %arg9: memref<2x1x8xf32, #tpu.memory_space<vmem>>, %arg10: memref<2x16x8xf32, #tpu.memory_space<vmem>>) attributes {dimension_semantics = [#tpu.dimension_semantics<parallel>], iteration_bounds = array<i64: 1>, scalar_prefetch = 0 : i64, scratch_operands = 0 : i64, tpu.core_type = #tpu.core_type<tc>, window_params = [{transform_indices = @transform_0, window_bounds = array<i64: 16, 32>}, {pipeline_mode = #tpu.pipeline_mode<synchronous>, transform_indices = @transform_1, window_bounds = array<i64: 2, 32, 8>}, {pipeline_mode = #tpu.pipeline_mode<synchronous>, transform_indices = @transform_2, window_bounds = array<i64: 2, 1, 8>}, {pipeline_mode = #tpu.pipeline_mode<synchronous>, transform_indices = @transform_3, window_bounds = array<i64: 2, 32, 8>}, {pipeline_mode = #tpu.pipeline_mode<synchronous>, transform_indices = @transform_4, window_bounds = array<i64: 2, 1, 8>}, {pipeline_mode = #tpu.pipeline_mode<synchronous>, transform_indices = @transform_5, window_bounds = array<i64: 2, 8, 24>}, {pipeline_mode = #tpu.pipeline_mode<synchronous>, transform_indices = @transform_6, window_bounds = array<i64: 2, 1, 24>}, {pipeline_mode = #tpu.pipeline_mode<synchronous>, transform_indices = @transform_7, window_bounds = array<i64: 2, 8, 8>}, {pipeline_mode = #tpu.pipeline_mode<synchronous>, transform_indices = @transform_8, window_bounds = array<i64: 2, 1, 8>}, {transform_indices = @transform_9, window_bounds = array<i64: 2, 16, 8>}]} {
    %c0 = arith.constant 0 : index
    %c0_0 = arith.constant 0 : index
    %0 = vector.load %arg1[%c0, %c0_0] : memref<16x32xbf16, #tpu.memory_space<vmem>>, vector<16x32xbf16>
    %c0_1 = arith.constant 0 : index
    %c0_2 = arith.constant 0 : index
    %c0_3 = arith.constant 0 : index
    %1 = vector.load %arg2[%c0_1, %c0_2, %c0_3] : memref<2x32x8xbf16, #tpu.memory_space<vmem>>, vector<1x32x8xbf16>
    %2 = vector.shape_cast %1 : vector<1x32x8xbf16> to vector<32x8xbf16>
    %cst = arith.constant dense<0.000000e+00> : vector<16x8xf32>
    %3 = tpu.matmul %0, %2, %cst {dimension_numbers = #tpu.dot_dimension_numbers<[1], [0], [0], [1], [0, 0, 1, 1], [], []>} : vector<16x32xbf16>, vector<32x8xbf16>, vector<16x8xf32> -> vector<16x8xf32>
    %c0_4 = arith.constant 0 : index
    %c0_5 = arith.constant 0 : index
    %c0_6 = arith.constant 0 : index
    %4 = vector.load %arg3[%c0_4, %c0_5, %c0_6] : memref<2x1x8xf32, #tpu.memory_space<vmem>>, vector<1x1x8xf32>
    %5 = vector.shape_cast %4 : vector<1x1x8xf32> to vector<1x8xf32>
    %6 = vector.broadcast %5 : vector<1x8xf32> to vector<16x8xf32>
    %7 = arith.addf %3, %6 : vector<16x8xf32>
    %c0_7 = arith.constant 0 : index
    %c0_8 = arith.constant 0 : index
    %c0_9 = arith.constant 0 : index
    %8 = vector.load %arg4[%c0_7, %c0_8, %c0_9] : memref<2x32x8xbf16, #tpu.memory_space<vmem>>, vector<1x32x8xbf16>
    %9 = vector.shape_cast %8 : vector<1x32x8xbf16> to vector<32x8xbf16>
    %cst_10 = arith.constant dense<0.000000e+00> : vector<16x8xf32>
    %10 = tpu.matmul %0, %9, %cst_10 {dimension_numbers = #tpu.dot_dimension_numbers<[1], [0], [0], [1], [0, 0, 1, 1], [], []>} : vector<16x32xbf16>, vector<32x8xbf16>, vector<16x8xf32> -> vector<16x8xf32>
    %c0_11 = arith.constant 0 : index
    %c0_12 = arith.constant 0 : index
    %c0_13 = arith.constant 0 : index
    %11 = vector.load %arg5[%c0_11, %c0_12, %c0_13] : memref<2x1x8xf32, #tpu.memory_space<vmem>>, vector<1x1x8xf32>
    %12 = vector.shape_cast %11 : vector<1x1x8xf32> to vector<1x8xf32>
    %13 = vector.broadcast %12 : vector<1x8xf32> to vector<16x8xf32>
    %14 = arith.addf %10, %13 : vector<16x8xf32>
    %15 = arith.truncf %7 : vector<16x8xf32> to vector<16x8xbf16>
    %16 = arith.truncf %14 : vector<16x8xf32> to vector<16x8xbf16>
    %c0_14 = arith.constant 0 : index
    %c0_15 = arith.constant 0 : index
    %c0_16 = arith.constant 0 : index
    %17 = vector.load %arg6[%c0_14, %c0_15, %c0_16] : memref<2x8x24xbf16, #tpu.memory_space<vmem>>, vector<1x8x24xbf16>
    %18 = vector.shape_cast %17 : vector<1x8x24xbf16> to vector<8x24xbf16>
    %cst_17 = arith.constant dense<0.000000e+00> : vector<16x24xf32>
    %19 = tpu.matmul %15, %18, %cst_17 {dimension_numbers = #tpu.dot_dimension_numbers<[1], [0], [0], [1], [0, 0, 1, 1], [], []>} : vector<16x8xbf16>, vector<8x24xbf16>, vector<16x24xf32> -> vector<16x24xf32>
    %c0_18 = arith.constant 0 : index
    %c0_19 = arith.constant 0 : index
    %c0_20 = arith.constant 0 : index
    %20 = vector.load %arg7[%c0_18, %c0_19, %c0_20] : memref<2x1x24xf32, #tpu.memory_space<vmem>>, vector<1x1x24xf32>
    %21 = vector.shape_cast %20 : vector<1x1x24xf32> to vector<1x24xf32>
    %22 = vector.broadcast %21 : vector<1x24xf32> to vector<16x24xf32>
    %23 = arith.addf %19, %22 : vector<16x24xf32>
    %c0_21 = arith.constant 0 : index
    %c0_22 = arith.constant 0 : index
    %c0_23 = arith.constant 0 : index
    %24 = vector.load %arg6[%c0_21, %c0_22, %c0_23] : memref<2x8x24xbf16, #tpu.memory_space<vmem>>, vector<1x8x24xbf16>
    %25 = vector.shape_cast %24 : vector<1x8x24xbf16> to vector<8x24xbf16>
    %cst_24 = arith.constant dense<0.000000e+00> : vector<16x24xf32>
    %26 = tpu.matmul %16, %25, %cst_24 {dimension_numbers = #tpu.dot_dimension_numbers<[1], [0], [0], [1], [0, 0, 1, 1], [], []>} : vector<16x8xbf16>, vector<8x24xbf16>, vector<16x24xf32> -> vector<16x24xf32>
    %c0_25 = arith.constant 0 : index
    %c0_26 = arith.constant 0 : index
    %c0_27 = arith.constant 0 : index
    %27 = vector.load %arg7[%c0_25, %c0_26, %c0_27] : memref<2x1x24xf32, #tpu.memory_space<vmem>>, vector<1x1x24xf32>
    %28 = vector.shape_cast %27 : vector<1x1x24xf32> to vector<1x24xf32>
    %29 = vector.broadcast %28 : vector<1x24xf32> to vector<16x24xf32>
    %30 = arith.addf %26, %29 : vector<16x24xf32>
    %31 = vector.extract_strided_slice %23 {offsets = [0, 0], sizes = [16, 8], strides = [1, 1]} : vector<16x24xf32> to vector<16x8xf32>
    %32 = vector.extract_strided_slice %23 {offsets = [0, 8], sizes = [16, 8], strides = [1, 1]} : vector<16x24xf32> to vector<16x8xf32>
    %33 = vector.extract_strided_slice %23 {offsets = [0, 16], sizes = [16, 8], strides = [1, 1]} : vector<16x24xf32> to vector<16x8xf32>
    %34 = vector.extract_strided_slice %30 {offsets = [0, 0], sizes = [16, 8], strides = [1, 1]} : vector<16x24xf32> to vector<16x8xf32>
    %35 = vector.extract_strided_slice %30 {offsets = [0, 8], sizes = [16, 8], strides = [1, 1]} : vector<16x24xf32> to vector<16x8xf32>
    %36 = vector.extract_strided_slice %30 {offsets = [0, 16], sizes = [16, 8], strides = [1, 1]} : vector<16x24xf32> to vector<16x8xf32>
    %37 = arith.subf %32, %35 : vector<16x8xf32>
    %38 = arith.mulf %31, %37 : vector<16x8xf32>
    %cst_28 = arith.constant dense<0.000000e+00> : vector<16xf32>
    %39 = vector.multi_reduction <add>, %38, %cst_28 [1] : vector<16x8xf32> to vector<16xf32>
    %40 = vector.shape_cast %39 : vector<16xf32> to vector<16x1xf32>
    %cst_29 = arith.constant 0.353553385 : f32
    %41 = vector.broadcast %cst_29 : f32 to vector<16x1xf32>
    %42 = arith.mulf %40, %41 : vector<16x1xf32>
    %43 = arith.mulf %34, %37 : vector<16x8xf32>
    %cst_30 = arith.constant dense<0.000000e+00> : vector<16xf32>
    %44 = vector.multi_reduction <add>, %43, %cst_30 [1] : vector<16x8xf32> to vector<16xf32>
    %45 = vector.shape_cast %44 : vector<16xf32> to vector<16x1xf32>
    %cst_31 = arith.constant 0.353553385 : f32
    %46 = vector.broadcast %cst_31 : f32 to vector<16x1xf32>
    %47 = arith.mulf %45, %46 : vector<16x1xf32>
    %cst_32 = arith.constant 5.000000e-01 : f32
    %48 = vector.broadcast %cst_32 : f32 to vector<16x1xf32>
    %49 = arith.mulf %48, %42 : vector<16x1xf32>
    %50 = math.tanh %49 : vector<16x1xf32>
    %cst_33 = arith.constant 5.000000e-01 : f32
    %51 = vector.broadcast %cst_33 : f32 to vector<16x1xf32>
    %52 = arith.mulf %51, %47 : vector<16x1xf32>
    %53 = math.tanh %52 : vector<16x1xf32>
    %54 = arith.addf %50, %53 : vector<16x1xf32>
    %cst_34 = arith.constant 2.500000e-01 : f32
    %55 = vector.broadcast %cst_34 : f32 to vector<16x1xf32>
    %56 = arith.mulf %55, %54 : vector<16x1xf32>
    %cst_35 = arith.constant 5.000000e-01 : f32
    %57 = vector.broadcast %cst_35 : f32 to vector<16x1xf32>
    %58 = arith.addf %56, %57 : vector<16x1xf32>
    %59 = vector.broadcast %58 : vector<16x1xf32> to vector<16x8xf32>
    %60 = arith.mulf %59, %33 : vector<16x8xf32>
    %cst_36 = arith.constant 1.000000e+00 : f32
    %61 = vector.broadcast %cst_36 : f32 to vector<16x1xf32>
    %62 = arith.subf %61, %58 : vector<16x1xf32>
    %63 = vector.broadcast %62 : vector<16x1xf32> to vector<16x8xf32>
    %64 = arith.mulf %63, %36 : vector<16x8xf32>
    %65 = arith.addf %60, %64 : vector<16x8xf32>
    %66 = arith.truncf %65 : vector<16x8xf32> to vector<16x8xbf16>
    %c0_37 = arith.constant 0 : index
    %c0_38 = arith.constant 0 : index
    %c0_39 = arith.constant 0 : index
    %67 = vector.load %arg8[%c0_37, %c0_38, %c0_39] : memref<2x8x8xbf16, #tpu.memory_space<vmem>>, vector<1x8x8xbf16>
    %68 = vector.shape_cast %67 : vector<1x8x8xbf16> to vector<8x8xbf16>
    %cst_40 = arith.constant dense<0.000000e+00> : vector<16x8xf32>
    %69 = tpu.matmul %66, %68, %cst_40 {dimension_numbers = #tpu.dot_dimension_numbers<[1], [0], [0], [1], [0, 0, 1, 1], [], []>} : vector<16x8xbf16>, vector<8x8xbf16>, vector<16x8xf32> -> vector<16x8xf32>
    %c0_41 = arith.constant 0 : index
    %c0_42 = arith.constant 0 : index
    %c0_43 = arith.constant 0 : index
    %70 = vector.load %arg9[%c0_41, %c0_42, %c0_43] : memref<2x1x8xf32, #tpu.memory_space<vmem>>, vector<1x1x8xf32>
    %71 = vector.shape_cast %70 : vector<1x1x8xf32> to vector<1x8xf32>
    %72 = vector.broadcast %71 : vector<1x8xf32> to vector<16x8xf32>
    %73 = arith.addf %69, %72 : vector<16x8xf32>
    %c0_44 = arith.constant 0 : index
    %c0_45 = arith.constant 0 : index
    %c0_46 = arith.constant 0 : index
    %74 = vector.load %arg10[%c0_44, %c0_45, %c0_46] : memref<2x16x8xf32, #tpu.memory_space<vmem>>, vector<1x16x8xf32>
    %75 = vector.shape_cast %74 : vector<1x16x8xf32> to vector<16x8xf32>
    %76 = vector.shape_cast %73 : vector<16x8xf32> to vector<1x16x8xf32>
    tpu.vector_store %arg10[%c0_44, %c0_45, %c0_46], %76 {strides = array<i32>} : memref<2x16x8xf32, #tpu.memory_space<vmem>>, vector<1x16x8xf32>,
    %c1 = arith.constant 1 : index
    %c0_47 = arith.constant 0 : index
    %c0_48 = arith.constant 0 : index
    %77 = vector.load %arg2[%c1, %c0_47, %c0_48] : memref<2x32x8xbf16, #tpu.memory_space<vmem>>, vector<1x32x8xbf16>
    %78 = vector.shape_cast %77 : vector<1x32x8xbf16> to vector<32x8xbf16>
    %cst_49 = arith.constant dense<0.000000e+00> : vector<16x8xf32>
    %79 = tpu.matmul %0, %78, %cst_49 {dimension_numbers = #tpu.dot_dimension_numbers<[1], [0], [0], [1], [0, 0, 1, 1], [], []>} : vector<16x32xbf16>, vector<32x8xbf16>, vector<16x8xf32> -> vector<16x8xf32>
    %c1_50 = arith.constant 1 : index
    %c0_51 = arith.constant 0 : index
    %c0_52 = arith.constant 0 : index
    %80 = vector.load %arg3[%c1_50, %c0_51, %c0_52] : memref<2x1x8xf32, #tpu.memory_space<vmem>>, vector<1x1x8xf32>
    %81 = vector.shape_cast %80 : vector<1x1x8xf32> to vector<1x8xf32>
    %82 = vector.broadcast %81 : vector<1x8xf32> to vector<16x8xf32>
    %83 = arith.addf %79, %82 : vector<16x8xf32>
    %c1_53 = arith.constant 1 : index
    %c0_54 = arith.constant 0 : index
    %c0_55 = arith.constant 0 : index
    %84 = vector.load %arg4[%c1_53, %c0_54, %c0_55] : memref<2x32x8xbf16, #tpu.memory_space<vmem>>, vector<1x32x8xbf16>
    %85 = vector.shape_cast %84 : vector<1x32x8xbf16> to vector<32x8xbf16>
    %cst_56 = arith.constant dense<0.000000e+00> : vector<16x8xf32>
    %86 = tpu.matmul %0, %85, %cst_56 {dimension_numbers = #tpu.dot_dimension_numbers<[1], [0], [0], [1], [0, 0, 1, 1], [], []>} : vector<16x32xbf16>, vector<32x8xbf16>, vector<16x8xf32> -> vector<16x8xf32>
    %c1_57 = arith.constant 1 : index
    %c0_58 = arith.constant 0 : index
    %c0_59 = arith.constant 0 : index
    %87 = vector.load %arg5[%c1_57, %c0_58, %c0_59] : memref<2x1x8xf32, #tpu.memory_space<vmem>>, vector<1x1x8xf32>
    %88 = vector.shape_cast %87 : vector<1x1x8xf32> to vector<1x8xf32>
    %89 = vector.broadcast %88 : vector<1x8xf32> to vector<16x8xf32>
    %90 = arith.addf %86, %89 : vector<16x8xf32>
    %91 = arith.truncf %83 : vector<16x8xf32> to vector<16x8xbf16>
    %92 = arith.truncf %90 : vector<16x8xf32> to vector<16x8xbf16>
    %c1_60 = arith.constant 1 : index
    %c0_61 = arith.constant 0 : index
    %c0_62 = arith.constant 0 : index
    %93 = vector.load %arg6[%c1_60, %c0_61, %c0_62] : memref<2x8x24xbf16, #tpu.memory_space<vmem>>, vector<1x8x24xbf16>
    %94 = vector.shape_cast %93 : vector<1x8x24xbf16> to vector<8x24xbf16>
    %cst_63 = arith.constant dense<0.000000e+00> : vector<16x24xf32>
    %95 = tpu.matmul %91, %94, %cst_63 {dimension_numbers = #tpu.dot_dimension_numbers<[1], [0], [0], [1], [0, 0, 1, 1], [], []>} : vector<16x8xbf16>, vector<8x24xbf16>, vector<16x24xf32> -> vector<16x24xf32>
    %c1_64 = arith.constant 1 : index
    %c0_65 = arith.constant 0 : index
    %c0_66 = arith.constant 0 : index
    %96 = vector.load %arg7[%c1_64, %c0_65, %c0_66] : memref<2x1x24xf32, #tpu.memory_space<vmem>>, vector<1x1x24xf32>
    %97 = vector.shape_cast %96 : vector<1x1x24xf32> to vector<1x24xf32>
    %98 = vector.broadcast %97 : vector<1x24xf32> to vector<16x24xf32>
    %99 = arith.addf %95, %98 : vector<16x24xf32>
    %c1_67 = arith.constant 1 : index
    %c0_68 = arith.constant 0 : index
    %c0_69 = arith.constant 0 : index
    %100 = vector.load %arg6[%c1_67, %c0_68, %c0_69] : memref<2x8x24xbf16, #tpu.memory_space<vmem>>, vector<1x8x24xbf16>
    %101 = vector.shape_cast %100 : vector<1x8x24xbf16> to vector<8x24xbf16>
    %cst_70 = arith.constant dense<0.000000e+00> : vector<16x24xf32>
    %102 = tpu.matmul %92, %101, %cst_70 {dimension_numbers = #tpu.dot_dimension_numbers<[1], [0], [0], [1], [0, 0, 1, 1], [], []>} : vector<16x8xbf16>, vector<8x24xbf16>, vector<16x24xf32> -> vector<16x24xf32>
    %c1_71 = arith.constant 1 : index
    %c0_72 = arith.constant 0 : index
    %c0_73 = arith.constant 0 : index
    %103 = vector.load %arg7[%c1_71, %c0_72, %c0_73] : memref<2x1x24xf32, #tpu.memory_space<vmem>>, vector<1x1x24xf32>
    %104 = vector.shape_cast %103 : vector<1x1x24xf32> to vector<1x24xf32>
    %105 = vector.broadcast %104 : vector<1x24xf32> to vector<16x24xf32>
    %106 = arith.addf %102, %105 : vector<16x24xf32>
    %107 = vector.extract_strided_slice %99 {offsets = [0, 0], sizes = [16, 8], strides = [1, 1]} : vector<16x24xf32> to vector<16x8xf32>
    %108 = vector.extract_strided_slice %99 {offsets = [0, 8], sizes = [16, 8], strides = [1, 1]} : vector<16x24xf32> to vector<16x8xf32>
    %109 = vector.extract_strided_slice %99 {offsets = [0, 16], sizes = [16, 8], strides = [1, 1]} : vector<16x24xf32> to vector<16x8xf32>
    %110 = vector.extract_strided_slice %106 {offsets = [0, 0], sizes = [16, 8], strides = [1, 1]} : vector<16x24xf32> to vector<16x8xf32>
    %111 = vector.extract_strided_slice %106 {offsets = [0, 8], sizes = [16, 8], strides = [1, 1]} : vector<16x24xf32> to vector<16x8xf32>
    %112 = vector.extract_strided_slice %106 {offsets = [0, 16], sizes = [16, 8], strides = [1, 1]} : vector<16x24xf32> to vector<16x8xf32>
    %113 = arith.subf %108, %111 : vector<16x8xf32>
    %114 = arith.mulf %107, %113 : vector<16x8xf32>
    %cst_74 = arith.constant dense<0.000000e+00> : vector<16xf32>
    %115 = vector.multi_reduction <add>, %114, %cst_74 [1] : vector<16x8xf32> to vector<16xf32>
    %116 = vector.shape_cast %115 : vector<16xf32> to vector<16x1xf32>
    %cst_75 = arith.constant 0.353553385 : f32
    %117 = vector.broadcast %cst_75 : f32 to vector<16x1xf32>
    %118 = arith.mulf %116, %117 : vector<16x1xf32>
    %119 = arith.mulf %110, %113 : vector<16x8xf32>
    %cst_76 = arith.constant dense<0.000000e+00> : vector<16xf32>
    %120 = vector.multi_reduction <add>, %119, %cst_76 [1] : vector<16x8xf32> to vector<16xf32>
    %121 = vector.shape_cast %120 : vector<16xf32> to vector<16x1xf32>
    %cst_77 = arith.constant 0.353553385 : f32
    %122 = vector.broadcast %cst_77 : f32 to vector<16x1xf32>
    %123 = arith.mulf %121, %122 : vector<16x1xf32>
    %cst_78 = arith.constant 5.000000e-01 : f32
    %124 = vector.broadcast %cst_78 : f32 to vector<16x1xf32>
    %125 = arith.mulf %124, %118 : vector<16x1xf32>
    %126 = math.tanh %125 : vector<16x1xf32>
    %cst_79 = arith.constant 5.000000e-01 : f32
    %127 = vector.broadcast %cst_79 : f32 to vector<16x1xf32>
    %128 = arith.mulf %127, %123 : vector<16x1xf32>
    %129 = math.tanh %128 : vector<16x1xf32>
    %130 = arith.addf %126, %129 : vector<16x1xf32>
    %cst_80 = arith.constant 2.500000e-01 : f32
    %131 = vector.broadcast %cst_80 : f32 to vector<16x1xf32>
    %132 = arith.mulf %131, %130 : vector<16x1xf32>
    %cst_81 = arith.constant 5.000000e-01 : f32
    %133 = vector.broadcast %cst_81 : f32 to vector<16x1xf32>
    %134 = arith.addf %132, %133 : vector<16x1xf32>
    %135 = vector.broadcast %134 : vector<16x1xf32> to vector<16x8xf32>
    %136 = arith.mulf %135, %109 : vector<16x8xf32>
    %cst_82 = arith.constant 1.000000e+00 : f32
    %137 = vector.broadcast %cst_82 : f32 to vector<16x1xf32>
    %138 = arith.subf %137, %134 : vector<16x1xf32>
    %139 = vector.broadcast %138 : vector<16x1xf32> to vector<16x8xf32>
    %140 = arith.mulf %139, %112 : vector<16x8xf32>
    %141 = arith.addf %136, %140 : vector<16x8xf32>
    %142 = arith.truncf %141 : vector<16x8xf32> to vector<16x8xbf16>
    %c1_83 = arith.constant 1 : index
    %c0_84 = arith.constant 0 : index
    %c0_85 = arith.constant 0 : index
    %143 = vector.load %arg8[%c1_83, %c0_84, %c0_85] : memref<2x8x8xbf16, #tpu.memory_space<vmem>>, vector<1x8x8xbf16>
    %144 = vector.shape_cast %143 : vector<1x8x8xbf16> to vector<8x8xbf16>
    %cst_86 = arith.constant dense<0.000000e+00> : vector<16x8xf32>
    %145 = tpu.matmul %142, %144, %cst_86 {dimension_numbers = #tpu.dot_dimension_numbers<[1], [0], [0], [1], [0, 0, 1, 1], [], []>} : vector<16x8xbf16>, vector<8x8xbf16>, vector<16x8xf32> -> vector<16x8xf32>
    %c1_87 = arith.constant 1 : index
    %c0_88 = arith.constant 0 : index
    %c0_89 = arith.constant 0 : index
    %146 = vector.load %arg9[%c1_87, %c0_88, %c0_89] : memref<2x1x8xf32, #tpu.memory_space<vmem>>, vector<1x1x8xf32>
    %147 = vector.shape_cast %146 : vector<1x1x8xf32> to vector<1x8xf32>
    %148 = vector.broadcast %147 : vector<1x8xf32> to vector<16x8xf32>
    %149 = arith.addf %145, %148 : vector<16x8xf32>
    %c1_90 = arith.constant 1 : index
    %c0_91 = arith.constant 0 : index
    %c0_92 = arith.constant 0 : index
    %150 = vector.load %arg10[%c1_90, %c0_91, %c0_92] : memref<2x16x8xf32, #tpu.memory_space<vmem>>, vector<1x16x8xf32>
    %151 = vector.shape_cast %150 : vector<1x16x8xf32> to vector<16x8xf32>
    %152 = vector.shape_cast %149 : vector<16x8xf32> to vector<1x16x8xf32>
    tpu.vector_store %arg10[%c1_90, %c0_91, %c0_92], %152 {strides = array<i32>} : memref<2x16x8xf32, #tpu.memory_space<vmem>>, vector<1x16x8xf32>,
    return
  }
  func.func @transform_0(%arg0: i32) -> (i32, i32) {
    %c0_i32 = arith.constant 0 : i32
    %c0_i32_0 = arith.constant 0 : i32
    return %arg0, %c0_i32 : i32, i32
  }
  func.func @transform_1(%arg0: i32) -> (i32, i32, i32) {
    %c0_i32 = arith.constant 0 : i32
    %c0_i32_0 = arith.constant 0 : i32
    %c0_i32_1 = arith.constant 0 : i32
    %c0_i32_2 = arith.constant 0 : i32
    return %c0_i32, %c0_i32_0, %c0_i32_1 : i32, i32, i32
  }
  func.func @transform_2(%arg0: i32) -> (i32, i32, i32) {
    %c0_i32 = arith.constant 0 : i32
    %c0_i32_0 = arith.constant 0 : i32
    %c0_i32_1 = arith.constant 0 : i32
    %c0_i32_2 = arith.constant 0 : i32
    return %c0_i32, %c0_i32_0, %c0_i32_1 : i32, i32, i32
  }
  func.func @transform_3(%arg0: i32) -> (i32, i32, i32) {
    %c0_i32 = arith.constant 0 : i32
    %c0_i32_0 = arith.constant 0 : i32
    %c0_i32_1 = arith.constant 0 : i32
    %c0_i32_2 = arith.constant 0 : i32
    return %c0_i32, %c0_i32_0, %c0_i32_1 : i32, i32, i32
  }
  func.func @transform_4(%arg0: i32) -> (i32, i32, i32) {
    %c0_i32 = arith.constant 0 : i32
    %c0_i32_0 = arith.constant 0 : i32
    %c0_i32_1 = arith.constant 0 : i32
    %c0_i32_2 = arith.constant 0 : i32
    return %c0_i32, %c0_i32_0, %c0_i32_1 : i32, i32, i32
  }
  func.func @transform_5(%arg0: i32) -> (i32, i32, i32) {
    %c0_i32 = arith.constant 0 : i32
    %c0_i32_0 = arith.constant 0 : i32
    %c0_i32_1 = arith.constant 0 : i32
    %c0_i32_2 = arith.constant 0 : i32
    return %c0_i32, %c0_i32_0, %c0_i32_1 : i32, i32, i32
  }
  func.func @transform_6(%arg0: i32) -> (i32, i32, i32) {
    %c0_i32 = arith.constant 0 : i32
    %c0_i32_0 = arith.constant 0 : i32
    %c0_i32_1 = arith.constant 0 : i32
    %c0_i32_2 = arith.constant 0 : i32
    return %c0_i32, %c0_i32_0, %c0_i32_1 : i32, i32, i32
  }
  func.func @transform_7(%arg0: i32) -> (i32, i32, i32) {
    %c0_i32 = arith.constant 0 : i32
    %c0_i32_0 = arith.constant 0 : i32
    %c0_i32_1 = arith.constant 0 : i32
    %c0_i32_2 = arith.constant 0 : i32
    return %c0_i32, %c0_i32_0, %c0_i32_1 : i32, i32, i32
  }
  func.func @transform_8(%arg0: i32) -> (i32, i32, i32) {
    %c0_i32 = arith.constant 0 : i32
    %c0_i32_0 = arith.constant 0 : i32
    %c0_i32_1 = arith.constant 0 : i32
    %c0_i32_2 = arith.constant 0 : i32
    return %c0_i32, %c0_i32_0, %c0_i32_1 : i32, i32, i32
  }
  func.func @transform_9(%arg0: i32) -> (i32, i32, i32) {
    %c0_i32 = arith.constant 0 : i32
    %c0_i32_0 = arith.constant 0 : i32
    %c0_i32_1 = arith.constant 0 : i32
    return %c0_i32, %arg0, %c0_i32_0 : i32, i32, i32
  }
}

</mosaic_0001>

<bundles_post_ra>
// kernel: variational_attention_le_encoder_forward.2
= control target key start
LH: loop header
LB: loop body
LE: loop exit
PB: predicated region body
PF: predicated region fallthrough
CT: control target
= control target key end

     0   :  { %v482_v0 = vmov 0.0   ;;  %vm483_vm0 = vmmov 0   ;;  %vm63_vm1 = vcmask 261120   ;;  %vm189_vm2 = vcmask 130048   ;;  %s589_s1 = inlined_call_operand.vmem [shape: bf16[1,32,16], index: 1, kind: input, shape index: {}]   ;;  %s590_s3 = inlined_call_operand.vmem [shape: bf16[1,32,16], index: 3, kind: input, shape index: {}]   ;;  %s591_s0 = inlined_call_operand.vmem [shape: bf16[16,32], index: 0, kind: input, shape index: {}]   ;;  %s592_s5 = inlined_call_operand.vmem [shape: bf16[1,16,48], index: 5, kind: input, shape index: {}]   ;;  %s593_s2 = inlined_call_operand.vmem [shape: f32[1,1,16], index: 2, kind: input, shape index: {}]   ;;  %s594_s4 = inlined_call_operand.vmem [shape: f32[1,1,16], index: 4, kind: input, shape index: {}]   ;;  %s595_s6 = inlined_call_operand.vmem [shape: f32[1,1,48], index: 6, kind: input, shape index: {}]   ;;  %s596_s7 = inlined_call_operand.vmem [shape: bf16[1,16,16], index: 7, kind: input, shape index: {}]   ;;  %s597_s8 = inlined_call_operand.vmem [shape: f32[1,1,16], index: 8, kind: input, shape index: {}]   ;;  %s598_s9 = inlined_call_operand.vmem [shape: f32[1,16,16], index: 9, kind: output, shape index: {}]  }
   0x1   :  { %429 = vmatprep.subr.bf16.mxu0 %v482_v0  ;;  %437 = vmatprep.subr.bf16.mxu1 %v482_v0  ;;  %v467_v1 = vld [vmem:[%s589_s1] sm:$0xff]   ;;  %v469_v3 = vld [vmem:[%s589_s1 + $0x8] sm:$0xff]  }
   0x2   :  { %v468_v2 = vld [vmem:[%s590_s3] sm:$0xff]   ;;  %433 = vmatprep.mubr.msk.bf16.mxu0 %vm483_vm0, %v482_v0  ;;  %441 = vmatprep.mubr.msk.bf16.mxu1 %vm483_vm0, %v482_v0  ;;  %v470_v4 = vld [vmem:[%s590_s3 + $0x8] sm:$0xff]  }
   0x3   :  { %430 = vmatpush3.bf16.msra.mxu0 %v467_v1  ;;  %438 = vmatpush3.bf16.msra.mxu1 %v468_v2  ;;  %v471_v5 = vld [vmem:[%s591_s0] sm:$0xff]  }
   0x4   :  { %431 = vmatprep.subr.bf16.mxu0 %v482_v0  ;;  %439 = vmatprep.subr.bf16.mxu1 %v482_v0  ;;  %v472_v6 = vld [vmem:[%s592_s5] sm:$0xff]   ;;  %s484_s5 = smov 112  }
   0x5   :  { %v401_v7 = vld [vmem:[%s593_s2] ss:$0 sm:$0xff] }
   0x6   :  { %v406_v9 = vld [vmem:[%s594_s4] ss:$0 sm:$0xff] }
   0x7   :  { %432 = vmatpush3.bf16.msra.mxu0 %v469_v3  ;;  %440 = vmatpush3.bf16.msra.mxu1 %v470_v4  ;;  %v410_v23 = vld [vmem:[%s595_s6] ss:$0 sm:$0xff] }
   0x8   :  { %445 = vmatprep.subr.bf16.mxu0 %v482_v0  ;;  %451 = vmatprep.subr.bf16.mxu1 %v482_v0  ;;  %v473_v48 = vld [vmem:[%s596_s7] sm:$0xff]   ;;  %s485_s7 = smov 96  }
   0xa   :  { %434 = vmatmul.mubr.msk.bf16.vlgmr.msra.gmra.mrb[0].mxu0 %vm63_vm1, %v471_v5  ;;  %442 = vmatmul.mubr.msk.bf16.vlgmr.msra.gmra.mrb[0].mxu1 %vm63_vm1, %v471_v5 }
   0xb   :  { %446 = vmatpush3.bf16.msra.mxu0 %v472_v6  ;;  %452 = vmatpush3.bf16.msra.mxu1 %v472_v6 }
   0xc   :  { %447 = vmatprep.mubr.msk.bf16.mxu0 %vm483_vm0, %v482_v0  ;;  %453 = vmatprep.mubr.msk.bf16.mxu1 %vm483_vm0, %v482_v0 }
   0xd   :  { %457 = vmatprep.subr.bf16.mxu0 %v482_v0 }
  0xdd   :  { %v101_v8 = vpop.f32.mrb[0].mxu0  ;;  %v165_v10 = vpop.f32.mrb[0].mxu1 }
  0xde   :  { %v435_v11 = vpop.f32.mrb[1].mxu0  ;;  %v443_v12 = vpop.f32.mrb[1].mxu1  ;;  %v102_v14 = vadd.f32 %v401_v7, %v101_v8  ;;  %v166_v18 = vadd.f32 %v406_v9, %v165_v10 }
  0xdf   :  { %v104_v13 = vpop.f32.mrb[2].mxu0  ;;  %v168_v16 = vpop.f32.mrb[2].mxu1 }
  0xe0   :  { %v105_v15 = vadd.f32 %v401_v7, %v104_v13  ;;  %v436_v17 = vpop.f32.mrb[3].mxu0  ;;  %v169_v19 = vadd.f32 %v406_v9, %v168_v16  ;;  %v444_v20 = vpop.f32.mrb[3].mxu1 }
  0xe1   :  { %v414_v17 = vld [vmem:[%s597_s8] ss:$0 sm:$0xff] }
  0xe2   :  { %v172_v21 = vpack.c.bf16 %v105_v15, %v102_v14  ;;  %v173_v22 = vpack.c.bf16 %v169_v19, %v166_v18 }
  0xe4   :  { %448 = vmatmul.mubr.msk.bf16.vlgmr.msra.gmra.mrb[4].mxu0 %vm189_vm2, %v172_v21  ;;  %454 = vmatmul.mubr.msk.bf16.vlgmr.msra.gmra.mrb[4].mxu1 %vm189_vm2, %v173_v22 }
  0xe5   :  { %459 = vmatprep.mubr.msk.bf16.mxu0 %vm483_vm0, %v482_v0  ;;  %458 = vmatpush3.bf16.msra.mxu0 %v473_v48 }
 0x1b7   :  { %v227_v24 = vpop.f32.mrb[4].mxu0  ;;  %v271_v26 = vpop.f32.mrb[4].mxu1 }
 0x1b8   :  { %v228_v25 = vadd.f32 %v410_v23, %v227_v24  ;;  %v449_v27 = vpop.f32.mrb[5].mxu0  ;;  %v272_v28 = vadd.f32 %v410_v23, %v271_v26  ;;  %v455_v29 = vpop.f32.mrb[5].mxu1 }
 0x1b9   :  { %v230_v30 = vpop.f32.mrb[6].mxu0  ;;  %v274_v31 = vpop.f32.mrb[6].mxu1 }
 0x1ba   :  { %v450_v32 = vpop.f32.mrb[7].mxu0  ;;  %v231_v33 = vadd.f32 %v410_v23, %v230_v30  ;;  %v275_v34 = vadd.f32 %v410_v23, %v274_v31  ;;  %v456_v35 = vpop.f32.mrb[7].mxu1  ;;  %v278_v36 = vsub.f32 %v228_v25, %v272_v28 }
 0x1bc   :  { %282 = vrot.lane.b32.xlu0 %v278_v36, %s484_s5  ;;  %v279_v37 = vsub.f32 %v231_v33, %v275_v34 }
 0x1c0   :  { %284 = vrot.lane.b32.xlu0 %v279_v37, %s484_s5 }
 0x22e   :  { %v283_v38 = vpop.permute.xlu0 %282 }
 0x22f   :  { %v298_v39 = vmul.f32 %v283_v38, %v272_v28  ;;  %v288_v40 = vmul.f32 %v283_v38, %v228_v25 }
 0x231   :  { %v290_v41 = vsel %vm189_vm2, %v288_v40, 0.0  ;;  %v300_v42 = vsel %vm189_vm2, %v298_v39, 0.0 }
 0x232   :  { %291 = vadd.xlane.f32.xlu1 %v290_v41  ;;  %301 = vadd.xlane.f32.xlu0 %v300_v42  ;;  %v285_v43 = vpop.permute.xlu0 %284 }
 0x233   :  { %v289_v44 = vmul.f32 %v285_v43, %v231_v33  ;;  %v299_v45 = vmul.f32 %v285_v43, %v275_v34 }
 0x235   :  { %v293_v46 = vsel %vm189_vm2, %v289_v44, 0.0  ;;  %v303_v47 = vsel %vm189_vm2, %v299_v45, 0.0 }
 0x236   :  { %294 = vadd.xlane.f32.xlu1 %v293_v46 }
 0x23a   :  { %304 = vadd.xlane.f32.xlu1 %v303_v47 }
 0x2bf   :  { %v292_v49 = vpop.xlane.xlu1 %291  ;;  %v302_v50 = vpop.xlane.xlu0 %301 }
 0x2c0   :  { %v296_v51 = vmul.f32 0.25, %v292_v49  ;;  %v306_v52 = vmul.f32 0.25, %v302_v50 }
 0x2c2   :  { %v308_v53 = vmul.f32 0.5, %v296_v51  ;;  %v312_v54 = vmul.f32 0.5, %v306_v52 }
 0x2c3   :  { %v295_v55 = vpop.xlane.xlu1 %294 }
 0x2c4   :  { %474 = vtanh.f32 %v308_v53  ;;  %v297_v56 = vmul.f32 0.25, %v295_v55 }
 0x2c5   :  { %476 = vtanh.f32 %v312_v54 }
 0x2c6   :  { %v309_v57 = vmul.f32 0.5, %v297_v56 }
 0x2c7   :  { %v305_v58 = vpop.xlane.xlu1 %304 }
 0x2c8   :  { %v307_v59 = vmul.f32 0.25, %v305_v58  ;;  %478 = vtanh.f32 %v309_v57 }
 0x2ca   :  { %v313_v60 = vmul.f32 0.5, %v307_v59 }
 0x2cc   :  { %480 = vtanh.f32 %v313_v60 }
 0x2ce   :  { %v475_v61 = vpop.eup %474 }
 0x2cf   :  { %v477_v62 = vpop.eup %476 }
 0x2d0   :  { %v316_v63 = vadd.f32 %v477_v62, %v475_v61 }
 0x2d2   :  { %v318_v0 = vmul.f32 0.25, %v316_v63  ;;  %v479_v1 = vpop.eup %478 }
 0x2d4   :  { %v320_v2 = vadd.f32 0.5, %v318_v0 }
 0x2d6   :  { %v481_v3 = vpop.eup %480  ;;  %v324_v6 = vsub.f32 1.0, %v320_v2  ;;  %v322_v10 = vmul.f32 %v320_v2, %v228_v25 }
 0x2d7   :  { %v317_v4 = vadd.f32 %v481_v3, %v479_v1 }
 0x2d8   :  { %v326_v9 = vmul.f32 %v324_v6, %v272_v28 }
 0x2d9   :  { %v319_v5 = vmul.f32 0.25, %v317_v4 }
 0x2da   :  { %v328_v13 = vadd.f32 %v326_v9, %v322_v10 }
 0x2db   :  { %v321_v7 = vadd.f32 0.5, %v319_v5 }
 0x2dd   :  { %v325_v8 = vsub.f32 1.0, %v321_v7  ;;  %v323_v11 = vmul.f32 %v321_v7, %v231_v33 }
 0x2df   :  { %v327_v12 = vmul.f32 %v325_v8, %v275_v34 }
 0x2e1   :  { %v329_v14 = vadd.f32 %v327_v12, %v323_v11 }
 0x2e3   :  { %v330_v15 = vpack.c.bf16 %v329_v14, %v328_v13 }
 0x2e5   :  { %341 = vrot.lane.b32.xlu1 %v330_v15, %s485_s7 }
 0x357   :  { %v342_v16 = vpop.permute.xlu1 %341 }
 0x358   :  { %460 = vmatmul.mubr.msk.bf16.vlgmr.msra.gmra.mrb[8].mxu0 %vm189_vm2, %v342_v16 }
 0x42b   :  { %v386_v18 = vpop.f32.mrb[8].mxu0 }
 0x42c   :  { %v387_v19 = vadd.f32 %v414_v17, %v386_v18  ;;  %v461_v20 = vpop.f32.mrb[9].mxu0 }
 0x42d   :  { %v389_v21 = vpop.f32.mrb[10].mxu0 }
 0x42e   :  { %v393_v22 = vmax.f32 %v387_v19, 0.0  ;;  %v390_v23 = vadd.f32 %v414_v17, %v389_v21  ;;  %v462_v24 = vpop.f32.mrb[11].mxu0 }
 0x430   :  { %395 = vst.msk [vmem:[%s598_s9] sm:$0xff] %vm189_vm2, %v393_v22  ;;  %v394_v25 = vmax.f32 %v390_v23, 0.0 }
 0x432   :  { %396 = vst.msk [vmem:[%s598_s9 + $0x8] sm:$0xff] %vm189_vm2, %v394_v25 }

// kernel: variational_attention_le_encoder_forward.3
= control target key start
LH: loop header
LB: loop body
LE: loop exit
PB: predicated region body
PF: predicated region fallthrough
CT: control target
= control target key end

     0   :  { %v907_v0 = vmov 0.0   ;;  %vm908_vm0 = vmmov 0   ;;  %vm186_vm1 = vcmask 1043456   ;;  %vm63_vm2 = vcmask 261120   ;;  %s909_s26 = smov 120   ;;  %s1128_s1 = inlined_call_operand.vmem [shape: bf16[2,32,8], index: 1, kind: input, shape index: {}]   ;;  %s1129_s3 = inlined_call_operand.vmem [shape: bf16[2,32,8], index: 3, kind: input, shape index: {}]   ;;  %s1130_s0 = inlined_call_operand.vmem [shape: bf16[16,32], index: 0, kind: input, shape index: {}]   ;;  %s1131_s5 = inlined_call_operand.vmem [shape: bf16[2,8,24], index: 5, kind: input, shape index: {}]   ;;  %s1132_s2 = inlined_call_operand.vmem [shape: f32[2,1,8], index: 2, kind: input, shape index: {}]   ;;  %s1133_s4 = inlined_call_operand.vmem [shape: f32[2,1,8], index: 4, kind: input, shape index: {}]   ;;  %s1134_s6 = inlined_call_operand.vmem [shape: f32[2,1,24], index: 6, kind: input, shape index: {}]   ;;  %s1135_s7 = inlined_call_operand.vmem [shape: bf16[2,8,8], index: 7, kind: input, shape index: {}]   ;;  %s1136_s8 = inlined_call_operand.vmem [shape: f32[2,1,8], index: 8, kind: input, shape index: {}]   ;;  %s1137_s9 = inlined_call_operand.vmem [shape: f32[2,16,8], index: 9, kind: output, shape index: {}]  }
   0x1   :  { %810 = vmatprep.subr.bf16.mxu0 %v907_v0  ;;  %818 = vmatprep.subr.bf16.mxu1 %v907_v0  ;;  %v882_v1 = vld [vmem:[%s1128_s1] sm:$0xff]   ;;  %v884_v3 = vld [vmem:[%s1128_s1 + $0x8] sm:$0xff]   ;;  %vm182_vm3 = vcmask 64512   ;;  %v887_v49 = vld [vmem:[%s1128_s1 + $0x10] sm:$0xff]  }
   0x2   :  { %v883_v2 = vld [vmem:[%s1129_s3] sm:$0xff]   ;;  %814 = vmatprep.mubr.msk.bf16.mxu0 %vm908_vm0, %v907_v0  ;;  %822 = vmatprep.mubr.msk.bf16.mxu1 %vm908_vm0, %v907_v0  ;;  %v885_v4 = vld [vmem:[%s1129_s3 + $0x8] sm:$0xff]  }
   0x3   :  { %811 = vmatpush3.bf16.msra.mxu0 %v882_v1  ;;  %819 = vmatpush3.bf16.msra.mxu1 %v883_v2  ;;  %v984_v5 = vld [vmem:[%s1130_s0] sm:$0xff]  }
   0x4   :  { %812 = vmatprep.subr.bf16.mxu0 %v907_v0  ;;  %820 = vmatprep.subr.bf16.mxu1 %v907_v0  ;;  %v174_v6 = vld [vmem:[%s1131_s5] sm:$0xf] }
   0x5   :  { %v188_v7 = vsel %vm186_vm1, %v174_v6, 0  ;;  %v743_v8 = vld [vmem:[%s1132_s2] ss:$0 sm:$0xff] }
   0x6   :  { %v748_v10 = vld [vmem:[%s1133_s4] ss:$0 sm:$0xff] }
   0x7   :  { %813 = vmatpush3.bf16.msra.mxu0 %v884_v3  ;;  %821 = vmatpush3.bf16.msra.mxu1 %v885_v4  ;;  %v752_v24 = vld [vmem:[%s1134_s6] ss:$0 sm:$0xff] }
   0x8   :  { %826 = vmatprep.subr.bf16.mxu0 %v907_v0  ;;  %832 = vmatprep.subr.bf16.mxu1 %v907_v0  ;;  %v328_v50 = vld [vmem:[%s1135_s7] sm:$0xf] }
   0x9   :  { %v343_v51 = vsel %vm186_vm1, %v328_v50, 0 }
   0xa   :  { %815 = vmatmul.mubr.msk.bf16.vlgmr.msra.gmra.mrb[0].mxu0 %vm63_vm2, %v984_v5  ;;  %823 = vmatmul.mubr.msk.bf16.vlgmr.msra.gmra.mrb[0].mxu1 %vm63_vm2, %v984_v5 }
   0xb   :  { %827 = vmatpush3.bf16.msra.mxu0 %v188_v7  ;;  %833 = vmatpush3.bf16.msra.mxu1 %v188_v7 }
   0xc   :  { %828 = vmatprep.mubr.msk.bf16.mxu0 %vm908_vm0, %v907_v0  ;;  %834 = vmatprep.mubr.msk.bf16.mxu1 %vm908_vm0, %v907_v0 }
   0xd   :  { %838 = vmatprep.subr.bf16.mxu0 %v907_v0  ;;  %844 = vmatprep.subr.bf16.mxu1 %v907_v0 }
  0xdd   :  { %v101_v9 = vpop.f32.mrb[0].mxu0  ;;  %v165_v11 = vpop.f32.mrb[0].mxu1 }
  0xde   :  { %v816_v12 = vpop.f32.mrb[1].mxu0  ;;  %v824_v13 = vpop.f32.mrb[1].mxu1  ;;  %v102_v15 = vadd.f32 %v743_v8, %v101_v9  ;;  %v166_v19 = vadd.f32 %v748_v10, %v165_v11 }
  0xdf   :  { %v104_v14 = vpop.f32.mrb[2].mxu0  ;;  %v168_v17 = vpop.f32.mrb[2].mxu1 }
  0xe0   :  { %v105_v16 = vadd.f32 %v743_v8, %v104_v14  ;;  %v817_v18 = vpop.f32.mrb[3].mxu0  ;;  %v169_v20 = vadd.f32 %v748_v10, %v168_v17  ;;  %v825_v21 = vpop.f32.mrb[3].mxu1  ;;  %v888_v10 = vld [vmem:[%s1128_s1 + $0x18] sm:$0xff]   ;;  %s910_s1 = smov 112  }
  0xe2   :  { %v172_v22 = vpack.c.bf16 %v105_v16, %v102_v15  ;;  %v173_v23 = vpack.c.bf16 %v169_v20, %v166_v19 }
  0xe4   :  { %829 = vmatmul.mubr.msk.bf16.vlgmr.msra.gmra.mrb[4].mxu0 %vm182_vm3, %v172_v22  ;;  %835 = vmatmul.mubr.msk.bf16.vlgmr.msra.gmra.mrb[4].mxu1 %vm182_vm3, %v173_v23  ;;  %v889_v22 = vld [vmem:[%s1129_s3 + $0x10] sm:$0xff]  }
  0xe5   :  { %840 = vmatprep.mubr.msk.bf16.mxu0 %vm908_vm0, %v907_v0  ;;  %848 = vmatprep.mubr.msk.bf16.mxu1 %vm908_vm0, %v907_v0 }
  0xe6   :  { %845 = vmatpush3.bf16.msra.mxu1 %v887_v49  ;;  %839 = vmatpush3.bf16.msra.mxu0 %v343_v51 }
  0xe7   :  { %846 = vmatprep.subr.bf16.mxu1 %v907_v0  ;;  %852 = vmatprep.subr.bf16.mxu0 %v907_v0 }
  0xea   :  { %847 = vmatpush3.bf16.msra.mxu1 %v888_v10 }
  0xeb   :  { %860 = vmatprep.subr.bf16.mxu1 %v907_v0 }
  0xed   :  { %849 = vmatmul.mubr.msk.bf16.vlgmr.msra.gmra.mrb[8].mxu1 %vm63_vm2, %v984_v5 }
  0xee   :  { %862 = vmatprep.mubr.msk.bf16.mxu1 %vm908_vm0, %v907_v0 }
 0x1b7   :  { %v224_v25 = vpop.f32.mrb[4].mxu0  ;;  %v268_v27 = vpop.f32.mrb[4].mxu1 }
 0x1b8   :  { %v1017_v26 = vadd.f32 %v752_v24, %v224_v25  ;;  %v830_v28 = vpop.f32.mrb[5].mxu0  ;;  %v1019_v29 = vadd.f32 %v752_v24, %v268_v27  ;;  %v836_v30 = vpop.f32.mrb[5].mxu1 }
 0x1b9   :  { %v227_v31 = vpop.f32.mrb[6].mxu0  ;;  %v271_v32 = vpop.f32.mrb[6].mxu1  ;;  %v775_v28 = vld [vmem:[%s1131_s5 + $0x4] sm:$0xf] }
 0x1ba   :  { %v831_v33 = vpop.f32.mrb[7].mxu0  ;;  %v1021_v34 = vadd.f32 %v752_v24, %v227_v31  ;;  %v1023_v35 = vadd.f32 %v752_v24, %v271_v32  ;;  %v837_v36 = vpop.f32.mrb[7].mxu1  ;;  %v275_v37 = vsub.f32 %v1017_v26, %v1019_v29  ;;  %v890_v24 = vld [vmem:[%s1129_s3 + $0x18] sm:$0xff]   ;;  %v536_v31 = vsel %vm186_vm1, %v775_v28, 0 }
 0x1bb   :  { %861 = vmatpush3.bf16.msra.mxu1 %v536_v31 }
 0x1bc   :  { %279 = vrot.lane.b32.xlu0 %v275_v37, %s909_s26  ;;  %v276_v38 = vsub.f32 %v1021_v34, %v1023_v35  ;;  %872 = vmatprep.subr.bf16.mxu1 %v907_v0 }
 0x1c0   :  { %281 = vrot.lane.b32.xlu0 %v276_v38, %s909_s26  ;;  %v447_v25 = vpop.f32.mrb[8].mxu1 }
 0x1c1   :  { %v850_v27 = vpop.f32.mrb[9].mxu1 }
 0x1c2   :  { %v450_v30 = vpop.f32.mrb[10].mxu1 }
 0x22e   :  { %v280_v39 = vpop.permute.xlu0 %279 }
 0x22f   :  { %v295_v40 = vmul.f32 %v280_v39, %v1019_v29  ;;  %v285_v41 = vmul.f32 %v280_v39, %v1017_v26 }
 0x231   :  { %v287_v42 = vsel %vm182_vm3, %v285_v41, 0.0  ;;  %v297_v43 = vsel %vm182_vm3, %v295_v40, 0.0 }
 0x232   :  { %288 = vadd.xlane.f32.xlu1 %v287_v42  ;;  %298 = vadd.xlane.f32.xlu0 %v297_v43  ;;  %v282_v44 = vpop.permute.xlu0 %281 }
 0x233   :  { %v286_v45 = vmul.f32 %v282_v44, %v1021_v34  ;;  %v296_v46 = vmul.f32 %v282_v44, %v1023_v35 }
 0x235   :  { %v290_v47 = vsel %vm182_vm3, %v286_v45, 0.0  ;;  %v300_v48 = vsel %vm182_vm3, %v296_v46, 0.0 }
 0x236   :  { %291 = vadd.xlane.f32.xlu1 %v290_v47 }
 0x23a   :  { %301 = vadd.xlane.f32.xlu1 %v300_v48 }
 0x2bf   :  { %v289_v52 = vpop.xlane.xlu1 %288  ;;  %v299_v53 = vpop.xlane.xlu0 %298 }
 0x2c0   :  { %v293_v54 = vmul.f32 0.35355338, %v289_v52  ;;  %v303_v55 = vmul.f32 0.35355338, %v299_v53  ;;  %v777_v52 = vld [vmem:[%s1134_s6 + $0x1] ss:$0 sm:$0xff] }
 0x2c2   :  { %v305_v56 = vmul.f32 0.5, %v293_v54  ;;  %v309_v57 = vmul.f32 0.5, %v303_v55 }
 0x2c3   :  { %v292_v58 = vpop.xlane.xlu1 %291 }
 0x2c4   :  { %891 = vtanh.f32 %v305_v56  ;;  %v294_v59 = vmul.f32 0.35355338, %v292_v58 }
 0x2c5   :  { %893 = vtanh.f32 %v309_v57 }
 0x2c6   :  { %v306_v60 = vmul.f32 0.5, %v294_v59 }
 0x2c7   :  { %v302_v61 = vpop.xlane.xlu1 %301 }
 0x2c8   :  { %v304_v62 = vmul.f32 0.35355338, %v302_v61  ;;  %895 = vtanh.f32 %v306_v60 }
 0x2ca   :  { %v310_v63 = vmul.f32 0.5, %v304_v62 }
 0x2cc   :  { %897 = vtanh.f32 %v310_v63 }
 0x2ce   :  { %v892_v1 = vpop.eup %891 }
 0x2cf   :  { %v894_v2 = vpop.eup %893 }
 0x2d0   :  { %v313_v3 = vadd.f32 %v894_v2, %v892_v1 }
 0x2d2   :  { %v315_v4 = vmul.f32 0.25, %v313_v3  ;;  %v896_v6 = vpop.eup %895 }
 0x2d4   :  { %v317_v7 = vadd.f32 0.5, %v315_v4 }
 0x2d6   :  { %v898_v8 = vpop.eup %897  ;;  %v321_v12 = vsub.f32 1.0, %v317_v7  ;;  %v319_v16 = vmul.f32 %v317_v7, %v1017_v26  ;;  %v762_v26 = vld [vmem:[%s1132_s2 + $0x1] ss:$0 sm:$0xff] }
 0x2d7   :  { %v314_v9 = vadd.f32 %v898_v8, %v896_v6  ;;  %v451_v32 = vadd.f32 %v762_v26, %v450_v30 }
 0x2d8   :  { %v323_v15 = vmul.f32 %v321_v12, %v1019_v29  ;;  %v448_v29 = vadd.f32 %v762_v26, %v447_v25 }
 0x2d9   :  { %v316_v11 = vmul.f32 0.25, %v314_v9 }
 0x2da   :  { %v325_v19 = vadd.f32 %v323_v15, %v319_v16  ;;  %v520_v33 = vpack.c.bf16 %v451_v32, %v448_v29 }
 0x2db   :  { %v318_v13 = vadd.f32 0.5, %v316_v11  ;;  %v780_v11 = vld [vmem:[%s1135_s7 + $0x4] sm:$0xf] }
 0x2dc   :  { %863 = vmatmul.mubr.msk.bf16.vlgmr.msra.gmra.mrb[12].mxu1 %vm182_vm3, %v520_v33  ;;  %v693_v12 = vsel %vm186_vm1, %v780_v11, 0 }
 0x2dd   :  { %v322_v14 = vsub.f32 1.0, %v318_v13  ;;  %v320_v17 = vmul.f32 %v318_v13, %v1021_v34  ;;  %874 = vmatprep.mubr.msk.bf16.mxu1 %vm908_vm0, %v907_v0  ;;  %v755_v34 = vld [vmem:[%s1136_s8] ss:$0 sm:$0xff]  ;;  %873 = vmatpush3.bf16.msra.mxu1 %v693_v12 }
 0x2df   :  { %v324_v18 = vmul.f32 %v322_v14, %v1023_v35 }
 0x2e1   :  { %v326_v20 = vadd.f32 %v324_v18, %v320_v17 }
 0x2e3   :  { %v327_v21 = vpack.c.bf16 %v326_v20, %v325_v19 }
 0x2e5   :  { %337 = vrot.lane.b32.xlu1 %v327_v21, %s910_s1 }
 0x357   :  { %v338_v23 = vpop.permute.xlu1 %337 }
 0x358   :  { %841 = vmatmul.mubr.msk.bf16.vlgmr.msra.gmra.mrb[8].mxu0 %vm182_vm3, %v338_v23 }
 0x359   :  { %853 = vmatpush3.bf16.msra.mxu0 %v889_v22  ;;  %856 = vmatprep.mubr.msk.bf16.mxu0 %vm908_vm0, %v907_v0 }
 0x35a   :  { %854 = vmatprep.subr.bf16.mxu0 %v907_v0 }
 0x35d   :  { %855 = vmatpush3.bf16.msra.mxu0 %v890_v24 }
 0x35e   :  { %866 = vmatprep.subr.bf16.mxu0 %v907_v0 }
 0x360   :  { %857 = vmatmul.mubr.msk.bf16.vlgmr.msra.gmra.mrb[12].mxu0 %vm63_vm2, %v984_v5  ;;  %v851_v5 = vpop.f32.mrb[11].mxu1 }
 0x361   :  { %868 = vmatprep.mubr.msk.bf16.mxu0 %vm908_vm0, %v907_v0  ;;  %867 = vmatpush3.bf16.msra.mxu0 %v536_v31  ;;  %v771_v0 = vld [vmem:[%s1133_s4 + $0x1] ss:$0 sm:$0xff] }
 0x3af   :  { %v572_v48 = vpop.f32.mrb[12].mxu1 }
 0x3b0   :  { %v864_v49 = vpop.f32.mrb[13].mxu1  ;;  %v573_v54 = vadd.f32 %v777_v52, %v572_v48 }
 0x3b1   :  { %v575_v50 = vpop.f32.mrb[14].mxu1 }
 0x3b2   :  { %v865_v51 = vpop.f32.mrb[15].mxu1  ;;  %v576_v61 = vadd.f32 %v777_v52, %v575_v50 }
 0x42b   :  { %v379_v35 = vpop.f32.mrb[8].mxu0 }
 0x42c   :  { %v380_v36 = vadd.f32 %v755_v34, %v379_v35  ;;  %v842_v37 = vpop.f32.mrb[9].mxu0 }
 0x42d   :  { %v382_v38 = vpop.f32.mrb[10].mxu0 }
 0x42e   :  { %386 = vst.msk [vmem:[%s1137_s9] sm:$0xff] %vm182_vm3, %v380_v36  ;;  %v383_v39 = vadd.f32 %v755_v34, %v382_v38  ;;  %v843_v40 = vpop.f32.mrb[11].mxu0 }
 0x430   :  { %387 = vst.msk [vmem:[%s1137_s9 + $0x8] sm:$0xff] %vm182_vm3, %v383_v39 }
 0x433   :  { %v513_v41 = vpop.f32.mrb[12].mxu0 }
 0x434   :  { %v858_v42 = vpop.f32.mrb[13].mxu0  ;;  %v514_v44 = vadd.f32 %v771_v0, %v513_v41 }
 0x435   :  { %v516_v43 = vpop.f32.mrb[14].mxu0 }
 0x436   :  { %v517_v45 = vadd.f32 %v771_v0, %v516_v43  ;;  %v859_v46 = vpop.f32.mrb[15].mxu0  ;;  %v782_v43 = vld [vmem:[%s1136_s8 + $0x1] ss:$0 sm:$0xff] }
 0x438   :  { %v521_v47 = vpack.c.bf16 %v517_v45, %v514_v44 }
 0x43a   :  { %869 = vmatmul.mubr.msk.bf16.vlgmr.msra.gmra.mrb[16].mxu0 %vm182_vm3, %v521_v47 }
 0x50d   :  { %v616_v53 = vpop.f32.mrb[16].mxu0 }
 0x50e   :  { %v617_v55 = vadd.f32 %v777_v52, %v616_v53  ;;  %v870_v56 = vpop.f32.mrb[17].mxu0 }
 0x50f   :  { %v619_v57 = vpop.f32.mrb[18].mxu0 }
 0x510   :  { %v620_v58 = vadd.f32 %v777_v52, %v619_v57  ;;  %v871_v59 = vpop.f32.mrb[19].mxu0  ;;  %v623_v60 = vsub.f32 %v573_v54, %v617_v55 }
 0x512   :  { %627 = vrot.lane.b32.xlu1 %v623_v60, %s909_s26  ;;  %v624_v62 = vsub.f32 %v576_v61, %v620_v58 }
 0x516   :  { %629 = vrot.lane.b32.xlu1 %v624_v62, %s909_s26 }
 0x584   :  { %v628_v63 = vpop.permute.xlu1 %627 }
 0x585   :  { %v633_v1 = vmul.f32 %v628_v63, %v573_v54  ;;  %v643_v2 = vmul.f32 %v628_v63, %v617_v55 }
 0x587   :  { %v645_v3 = vsel %vm182_vm3, %v643_v2, 0.0  ;;  %v635_v4 = vsel %vm182_vm3, %v633_v1, 0.0 }
 0x588   :  { %646 = vadd.xlane.f32.xlu0 %v645_v3  ;;  %636 = vadd.xlane.f32.xlu1 %v635_v4  ;;  %v630_v6 = vpop.permute.xlu1 %629 }
 0x589   :  { %v634_v7 = vmul.f32 %v630_v6, %v576_v61  ;;  %v644_v8 = vmul.f32 %v630_v6, %v620_v58 }
 0x58b   :  { %v638_v9 = vsel %vm182_vm3, %v634_v7, 0.0  ;;  %v648_v10 = vsel %vm182_vm3, %v644_v8, 0.0 }
 0x58c   :  { %639 = vadd.xlane.f32.xlu0 %v638_v9 }
 0x590   :  { %649 = vadd.xlane.f32.xlu0 %v648_v10 }
 0x615   :  { %v647_v13 = vpop.xlane.xlu0 %646  ;;  %v637_v14 = vpop.xlane.xlu1 %636 }
 0x616   :  { %v651_v15 = vmul.f32 0.35355338, %v647_v13  ;;  %v641_v16 = vmul.f32 0.35355338, %v637_v14 }
 0x618   :  { %v657_v17 = vmul.f32 0.5, %v651_v15  ;;  %v653_v18 = vmul.f32 0.5, %v641_v16 }
 0x619   :  { %v640_v19 = vpop.xlane.xlu0 %639 }
 0x61a   :  { %899 = vtanh.f32 %v657_v17  ;;  %v642_v20 = vmul.f32 0.35355338, %v640_v19 }
 0x61b   :  { %901 = vtanh.f32 %v653_v18 }
 0x61c   :  { %v654_v21 = vmul.f32 0.5, %v642_v20 }
 0x61d   :  { %v650_v22 = vpop.xlane.xlu0 %649 }
 0x61e   :  { %v652_v23 = vmul.f32 0.35355338, %v650_v22  ;;  %903 = vtanh.f32 %v654_v21 }
 0x620   :  { %v658_v24 = vmul.f32 0.5, %v652_v23 }
 0x622   :  { %905 = vtanh.f32 %v658_v24 }
 0x624   :  { %v900_v25 = vpop.eup %899 }
 0x625   :  { %v902_v26 = vpop.eup %901 }
 0x626   :  { %v661_v27 = vadd.f32 %v902_v26, %v900_v25 }
 0x628   :  { %v663_v28 = vmul.f32 0.25, %v661_v27  ;;  %v904_v29 = vpop.eup %903 }
 0x62a   :  { %v665_v30 = vadd.f32 0.5, %v663_v28 }
 0x62c   :  { %v906_v31 = vpop.eup %905  ;;  %v669_v33 = vsub.f32 1.0, %v665_v30  ;;  %v667_v37 = vmul.f32 %v665_v30, %v573_v54 }
 0x62d   :  { %v662_v32 = vadd.f32 %v906_v31, %v904_v29 }
 0x62e   :  { %v671_v36 = vmul.f32 %v669_v33, %v617_v55 }
 0x62f   :  { %v664_v5 = vmul.f32 0.25, %v662_v32 }
 0x630   :  { %v673_v40 = vadd.f32 %v671_v36, %v667_v37 }
 0x631   :  { %v666_v34 = vadd.f32 0.5, %v664_v5 }
 0x633   :  { %v670_v35 = vsub.f32 1.0, %v666_v34  ;;  %v668_v38 = vmul.f32 %v666_v34, %v576_v61 }
 0x635   :  { %v672_v39 = vmul.f32 %v670_v35, %v620_v58 }
 0x637   :  { %v674_v0 = vadd.f32 %v672_v39, %v668_v38 }
 0x639   :  { %v675_v41 = vpack.c.bf16 %v674_v0, %v673_v40 }
 0x63b   :  { %687 = vrot.lane.b32.xlu0 %v675_v41, %s910_s1 }
 0x6ad   :  { %v688_v42 = vpop.permute.xlu0 %687 }
 0x6ae   :  { %875 = vmatmul.mubr.msk.bf16.vlgmr.msra.gmra.mrb[16].mxu1 %vm182_vm3, %v688_v42 }
 0x781   :  { %v729_v44 = vpop.f32.mrb[16].mxu1 }
 0x782   :  { %v730_v45 = vadd.f32 %v782_v43, %v729_v44  ;;  %v876_v46 = vpop.f32.mrb[17].mxu1 }
 0x783   :  { %v732_v47 = vpop.f32.mrb[18].mxu1 }
 0x784   :  { %784 = vst.msk [vmem:[%s1137_s9 + $0x10] sm:$0xff] %vm182_vm3, %v730_v45  ;;  %v733_v48 = vadd.f32 %v782_v43, %v732_v47  ;;  %v877_v49 = vpop.f32.mrb[19].mxu1 }
 0x786   :  { %785 = vst.msk [vmem:[%s1137_s9 + $0x18] sm:$0xff] %vm182_vm3, %v733_v48 }

</bundles_post_ra>
